<compile_context>
chip_gen: v7x
topology: tpu7x:2x2x1
jax: 0.10.0
libtpu: 0.0.40
codegen_flags: <defaults>
</compile_context>

<pallas_src>
import jax
import jax.numpy as jnp
from jax.experimental import pallas as pl
from jax.experimental.pallas import tpu as pltpu


def _se_kernel(x_ref, w1t_ref, w2t_ref, out_ref):
    # x_ref/out_ref: [TB, HW, C]; w1t_ref: [C, C_red]; w2t_ref: [C_red, C]
    x = x_ref[...]                                           # stays in input dtype
    hw = x_ref.shape[1]

    # Squeeze: global average pool over HW (sublane axis), f32 accumulation.
    y = jnp.sum(x, axis=1, dtype=jnp.float32) / jnp.float32(hw)     # [TB, C]

    # Excitation: Linear -> ReLU -> Linear -> Hsigmoid (tiny, latency-trivial).
    h = jnp.dot(y, w1t_ref[...].astype(jnp.float32),
                preferred_element_type=jnp.float32)                 # [TB, C_red]
    h = jnp.maximum(h, 0.0)                                         # ReLU
    s = jnp.dot(h, w2t_ref[...].astype(jnp.float32),
                preferred_element_type=jnp.float32)                 # [TB, C]
    s = jnp.clip(s + 3.0, 0.0, 6.0) * (1.0 / 6.0)                   # Hsigmoid

    # Scale: broadcast per-channel gate over HW, multiply/store in input dtype.
    out_ref[...] = (x * s.astype(x.dtype)[:, None, :]).astype(out_ref.dtype)


def _pick_batch_tile(b, hw, c, itemsize, *, max_block_bytes=12 * 2**20, max_tb=8):
    """Largest batch tile (divisor of b, <= max_tb) whose block fits the budget."""
    per_sample = hw * c * itemsize
    tb = int(max(1, min(max_tb, b, max_block_bytes // max(per_sample, 1))))
    while b % tb:  # keep every grid block full (no partial/OOB batch blocks)
        tb -= 1
    return tb


def se_module_nhwc_flat(x_flat, w1, w2, *, batch_tile=None):
    """SE forward on channels-last, spatially-flattened input.

    x_flat : [B, H*W, C]
    w1     : [C // r, C]   (first  nn.Linear weight, no bias)
    w2     : [C, C // r]   (second nn.Linear weight, no bias)
    """
    b, hw, c = x_flat.shape
    c_red = w1.shape[0]
    assert w1.shape == (c_red, c) and w2.shape == (c, c_red)

    # Pre-transpose once outside the kernel (free) so the kernel has no .T.
    w1_t = jnp.transpose(w1)                  # [C, C_red]
    w2_t = jnp.transpose(w2)                  # [C_red, C]

    itemsize = jnp.dtype(x_flat.dtype).itemsize
    tb = batch_tile if batch_tile is not None else _pick_batch_tile(b, hw, c, itemsize)
    assert b % tb == 0, "batch_tile must divide batch"
    grid = (b // tb,)

    block_bytes = tb * hw * c * itemsize
    w_bytes = w1.size * w1.dtype.itemsize + w2.size * w2.dtype.itemsize
    # 2 input + 2 output buffers (double-buffered pipeline) + resident weights.
    vmem_needed = 4 * block_bytes + 2 * w_bytes + (2 << 20)
    # TODO(synk): if a single [HW, C] sample block exceeds ~half of v7x's 64 MiB
    # VMEM, split into a pool pass (HW-tiled) + scale pass instead of one block.
    vmem_limit = int(min(112 * 2**20, max(32 * 2**20, vmem_needed)))

    cost = pl.CostEstimate(
        flops=2 * b * hw * c + 4 * b * c * c_red,
        transcendentals=0,
        bytes_accessed=2 * x_flat.size * itemsize + 2 * w_bytes,
    )

    return pl.pallas_call(
        _se_kernel,
        out_shape=jax.ShapeDtypeStruct((b, hw, c), x_flat.dtype),
        grid_spec=pltpu.PrefetchScalarGridSpec(
            num_scalar_prefetch=0,
            grid=grid,
            in_specs=[
                pl.BlockSpec((tb, hw, c), lambda i: (i, 0, 0)),
                pl.BlockSpec((c, c_red), lambda i: (0, 0)),   # resident weights
                pl.BlockSpec((c_red, c), lambda i: (0, 0)),   # resident weights
            ],
            out_specs=pl.BlockSpec((tb, hw, c), lambda i: (i, 0, 0)),
        ),
        compiler_params=pltpu.CompilerParams(
            dimension_semantics=("parallel",),
            vmem_limit_bytes=vmem_limit,
        ),
        cost_estimate=cost,
    )(x_flat, w1_t, w2_t)


def se_module_nhwc(x_nhwc, w1, w2, *, batch_tile=None):
    """SE forward for NHWC activations (preferred, lane-dense entry point)."""
    b, h, w, c = x_nhwc.shape
    out = se_module_nhwc_flat(x_nhwc.reshape(b, h * w, c), w1, w2,
                              batch_tile=batch_tile)
    return out.reshape(b, h, w, c)


def se_module(x, w1, w2, *, batch_tile=None):
    """SEModule forward, NCHW input (matching the PyTorch module).

    The NCHW<->NHWC transpose here is wrapper-side layout plumbing; if the
    upstream activations are already NHWC, call `se_module_nhwc` directly.
    """
    b, c, h, w = x.shape
    x_flat = jnp.transpose(x, (0, 2, 3, 1)).reshape(b, h * w, c)
    out = se_module_nhwc_flat(x_flat, w1, w2, batch_tile=batch_tile)
    return jnp.transpose(out.reshape(b, h, w, c), (0, 3, 1, 2))


def _reference(x, w1, w2):
    # Pure-JAX reference matching the PyTorch module (NCHW).
    y = jnp.mean(x, axis=(2, 3))                  # [B, C]
    y = jnp.maximum(y @ w1.T, 0.0)                # [B, C_red]
    y = jnp.clip(y @ w2.T + 3.0, 0.0, 6.0) / 6.0  # [B, C]
    return x * y[:, :, None, None]


if __name__ == "__main__":
    key = jax.random.PRNGKey(0)
    kx, k1, k2 = jax.random.split(key, 3)

    B, C, H, W = 4, 128, 8, 8
    reduction = 4
    C_red = C // reduction

    x = jax.random.normal(kx, (B, C, H, W), dtype=jnp.float32)
    w1 = jax.random.uniform(k1, (C_red, C), dtype=jnp.float32,
                            minval=-1.0 / C ** 0.5, maxval=1.0 / C ** 0.5)
    w2 = jax.random.uniform(k2, (C, C_red), dtype=jnp.float32,
                            minval=-1.0 / C_red ** 0.5, maxval=1.0 / C_red ** 0.5)

    ref = _reference(x, w1, w2)

    # Auto-tiled path: biggest batch block that fits the VMEM budget.
    out_auto = jax.block_until_ready(se_module(x, w1, w2))
    # Per-sample blocks: multi-step grid, exercises the double-buffered pipeline.
    out_grid = jax.block_until_ready(se_module(x, w1, w2, batch_tile=1))

    assert out_auto.shape == (B, C, H, W)
    # Tolerance allows for MXU f32 matmul pass rounding vs. the XLA reference dot.
    assert jnp.allclose(out_auto, ref, atol=1e-4, rtol=1e-4), "auto-tile mismatch"
    assert jnp.allclose(out_grid, ref, atol=1e-4, rtol=1e-4), "per-sample grid mismatch"
    print("KERNEL_OK")
</pallas_src>

<mosaic_0001>
module attributes {stable_mosaic.version = 11 : i64} {
  func.func @_se_kernel(%arg0: i32, %arg1: memref<4x64x128xf32, #tpu.memory_space<vmem>>, %arg2: memref<128x32xf32, #tpu.memory_space<vmem>>, %arg3: memref<32x128xf32, #tpu.memory_space<vmem>>, %arg4: memref<4x64x128xf32, #tpu.memory_space<vmem>>) attributes {dimension_semantics = [#tpu.dimension_semantics<parallel>], iteration_bounds = array<i64: 1>, scalar_prefetch = 0 : i64, scratch_operands = 0 : i64, tpu.core_type = #tpu.core_type<tc>, window_params = [{transform_indices = @transform_0, window_bounds = array<i64: 4, 64, 128>}, {pipeline_mode = #tpu.pipeline_mode<synchronous>, transform_indices = @transform_1, window_bounds = array<i64: 128, 32>}, {pipeline_mode = #tpu.pipeline_mode<synchronous>, transform_indices = @transform_2, window_bounds = array<i64: 32, 128>}, {transform_indices = @transform_3, window_bounds = array<i64: 4, 64, 128>}]} {
    %c0 = arith.constant 0 : index
    %c0_0 = arith.constant 0 : index
    %c0_1 = arith.constant 0 : index
    %0 = vector.load %arg1[%c0, %c0_0, %c0_1] : memref<4x64x128xf32, #tpu.memory_space<vmem>>, vector<4x64x128xf32>
    %cst = arith.constant dense<0.000000e+00> : vector<4x128xf32>
    %1 = vector.multi_reduction <add>, %0, %cst [1] : vector<4x64x128xf32> to vector<4x128xf32>
    %cst_2 = arith.constant 6.400000e+01 : f32
    %2 = vector.broadcast %cst_2 : f32 to vector<4x128xf32>
    %3 = arith.divf %1, %2 : vector<4x128xf32>
    %c0_3 = arith.constant 0 : index
    %c0_4 = arith.constant 0 : index
    %4 = vector.load %arg2[%c0_3, %c0_4] : memref<128x32xf32, #tpu.memory_space<vmem>>, vector<128x32xf32>
    %cst_5 = arith.constant dense<0.000000e+00> : vector<4x32xf32>
    %5 = tpu.matmul %3, %4, %cst_5 {dimension_numbers = #tpu.dot_dimension_numbers<[1], [0], [0], [1], [0, 0, 1, 1], [], []>} : vector<4x128xf32>, vector<128x32xf32>, vector<4x32xf32> -> vector<4x32xf32>
    %cst_6 = arith.constant 0.000000e+00 : f32
    %6 = vector.broadcast %cst_6 : f32 to vector<4x32xf32>
    %7 = arith.maximumf %5, %6 : vector<4x32xf32>
    %c0_7 = arith.constant 0 : index
    %c0_8 = arith.constant 0 : index
    %8 = vector.load %arg3[%c0_7, %c0_8] : memref<32x128xf32, #tpu.memory_space<vmem>>, vector<32x128xf32>
    %cst_9 = arith.constant dense<0.000000e+00> : vector<4x128xf32>
    %9 = tpu.matmul %7, %8, %cst_9 {dimension_numbers = #tpu.dot_dimension_numbers<[1], [0], [0], [1], [0, 0, 1, 1], [], []>} : vector<4x32xf32>, vector<32x128xf32>, vector<4x128xf32> -> vector<4x128xf32>
    %cst_10 = arith.constant 3.000000e+00 : f32
    %10 = vector.broadcast %cst_10 : f32 to vector<4x128xf32>
    %11 = arith.addf %9, %10 : vector<4x128xf32>
    %cst_11 = arith.constant 0.000000e+00 : f32
    %cst_12 = arith.constant 6.000000e+00 : f32
    %12 = vector.broadcast %cst_11 : f32 to vector<4x128xf32>
    %13 = arith.maximumf %12, %11 : vector<4x128xf32>
    %14 = vector.broadcast %cst_12 : f32 to vector<4x128xf32>
    %15 = arith.minimumf %14, %13 : vector<4x128xf32>
    %cst_13 = arith.constant 0.166666672 : f32
    %16 = vector.broadcast %cst_13 : f32 to vector<4x128xf32>
    %17 = arith.mulf %15, %16 : vector<4x128xf32>
    %18 = vector.shape_cast %17 : vector<4x128xf32> to vector<4x1x128xf32>
    %19 = vector.broadcast %18 : vector<4x1x128xf32> to vector<4x64x128xf32>
    %20 = arith.mulf %0, %19 : vector<4x64x128xf32>
    %c0_14 = arith.constant 0 : index
    %c0_15 = arith.constant 0 : index
    %c0_16 = arith.constant 0 : index
    %21 = vector.load %arg4[%c0_14, %c0_15, %c0_16] : memref<4x64x128xf32, #tpu.memory_space<vmem>>, vector<4x64x128xf32>
    tpu.vector_store %arg4[%c0_14, %c0_15, %c0_16], %20 {strides = array<i32>} : memref<4x64x128xf32, #tpu.memory_space<vmem>>, vector<4x64x128xf32>,
    return
  }
  func.func @transform_0(%arg0: i32) -> (i32, i32, i32) {
    %c0_i32 = arith.constant 0 : i32
    %c0_i32_0 = arith.constant 0 : i32
    %c0_i32_1 = arith.constant 0 : i32
    return %arg0, %c0_i32, %c0_i32_0 : i32, i32, i32
  }
  func.func @transform_1(%arg0: i32) -> (i32, i32) {
    %c0_i32 = arith.constant 0 : i32
    %c0_i32_0 = arith.constant 0 : i32
    %c0_i32_1 = arith.constant 0 : i32
    return %c0_i32, %c0_i32_0 : i32, i32
  }
  func.func @transform_2(%arg0: i32) -> (i32, i32) {
    %c0_i32 = arith.constant 0 : i32
    %c0_i32_0 = arith.constant 0 : i32
    %c0_i32_1 = arith.constant 0 : i32
    return %c0_i32, %c0_i32_0 : i32, i32
  }
  func.func @transform_3(%arg0: i32) -> (i32, i32, i32) {
    %c0_i32 = arith.constant 0 : i32
    %c0_i32_0 = arith.constant 0 : i32
    %c0_i32_1 = arith.constant 0 : i32
    return %arg0, %c0_i32, %c0_i32_0 : i32, i32, i32
  }
}

</mosaic_0001>

<bundles_post_ra>
// kernel: tpu_custom_call.1
= control target key start
LH: loop header
LB: loop body
LE: loop exit
PB: predicated region body
PF: predicated region fallthrough
CT: control target
= control target key end

     0   :  { %8 = vsyncpa [#allocation3], 0  ;;  %s834_s0 = inlined_call_operand.hbm [shape: f32[4,64,128], index: 0, kind: input, shape index: {}]   ;;  %s835_s1 = inlined_call_operand.vmem [shape: f32[128,32], index: 1, kind: input, shape index: {}]   ;;  %s836_s2 = inlined_call_operand.vmem [shape: f32[32,128], index: 2, kind: input, shape index: {}]   ;;  %s837_s3 = inlined_call_operand.hbm [shape: f32[4,64,128], index: 3, kind: output, shape index: {}]  }
   0x1   :  { %9 = vsyncpa [#allocation4], 0  ;;  %s578_s12 = smov [#allocation2]   ;;  %s530_s16 = scalar_lea.hbm %s834_s0, 4096 }
   0x2   :  { %s15_s13 = sshll.u32 %s578_s12, 4  ;;  %p531_p0 = scmp.ne.s32.totalorder %s834_s0, %s530_s16  ;;  %s16_s13 = int_to_ptr.vmem [resolvable:$true] %s15_s13 }
   0x3   :  { %p534_p1 = scmp.lt.u32.totalorder %s530_s16, %s834_s0 }
   0x5   :  { %p536_p2 = pnand %p534_p1, %p531_p0 }
   0x7   :  { %539 = shalt.err (!%p536_p2)
}
   0x8   :  { %s540_s21 = scalar_lea.vmem %s16_s13, 4096  ;;  %p545_p4 = scmp.lt.s32.totalorder %s16_s13, %s16_s13 }
   0x9   :  { %p541_p3 = scmp.ne.s32.totalorder %s16_s13, %s540_s21  ;;  %p546_p5 = scmp.lt.s32.totalorder %s540_s21, %s540_s21 }
   0xb   :  { %p547_p6 = por %p546_p5, %p545_p4 }
   0xd   :  { %p548_p7 = pnand %p547_p6, %p541_p3 }
   0xf   :  { %551 = shalt.err (!%p548_p7)
}
  0x10   :  { %s579_s22 = smov 128   ;;  %s580_s23 = smov 8  }
  0x11   :  { %21 = dma.hbm_to_vmem [thread:$0]  %s834_s0, 4096, %s16_s13, [#allocation3], %s579_s22, %s579_s22, %s580_s23  }
  0x12   :  { %574 = dma.done.wait [#allocation3], 4096  }
  0x13   :  { %575 = vsyncadd [#allocation3], 4294963200  ;;  %v581_v0 = vmov 0.0|0.0   ;;  %vm582_vm0 = vmmov 0   ;;  %v583_v1 = vmov 0.0   ;;  %v118_v2 = vld [vmem:[%s835_s1] sm:$0xff] }
  0x14   :  { %492 = vmatprep.subr.bf16.mxu0 %v581_v0  ;;  %478 = vmatprep.mubr.msk.f32.mxu0 %vm582_vm0, %v583_v1  ;;  %v119_v3 = vld [vmem:[%s835_s1 + $0x8] sm:$0xff]  ;;  %v120_v4 = vld [vmem:[%s835_s1 + $0x10] sm:$0xff]  ;;  %v121_v6 = vld [vmem:[%s835_s1 + $0x18] sm:$0xff]  ;;  %vm138_vm1 = vcmask 1041409   ;;  %vm140_vm2 = vcmask 1042434   ;;  %vm142_vm3 = vcmask 1043459  }
  0x15   :  { %516 = vmatprep.subr.bf16.mxu1 %v581_v0  ;;  %489 = vmatprep.mubr.msk.f32.mxu1 %vm582_vm0, %v583_v1  ;;  %v493_v5 = vpack.c.bf16 %v119_v3, %v118_v2  ;;  %v496_v7 = vpack.c.bf16 %v121_v6, %v120_v4  ;;  %v122_v8 = vld [vmem:[%s835_s1 + $0x20] sm:$0xff]  ;;  %v123_v9 = vld [vmem:[%s835_s1 + $0x28] sm:$0xff]  ;;  %v646_v12 = vld [vmem:[#allocation2 + $0x10] sm:$0xff]  ;;  %vm220_vm4 = vcmask 261120  }
  0x16   :  { %v642_v10 = vld [vmem:[#allocation2] sm:$0xff]  ;;  %v644_v11 = vld [vmem:[#allocation2 + $0x8] sm:$0xff]  ;;  %v499_v14 = vpack.c.bf16 %v123_v9, %v122_v8  ;;  %v124_v15 = vld [vmem:[%s835_s1 + $0x30] sm:$0xff] }
  0x17   :  { %494 = vmatpush3.bf16.msra.mxu0 %v493_v5  ;;  %v61_v13 = vadd.f32 %v644_v11, %v642_v10  ;;  %v125_v16 = vld [vmem:[%s835_s1 + $0x38] sm:$0xff]  ;;  %v659_v18 = vld [vmem:[#allocation2 + $0x40] sm:$0xff]  ;;  %v661_v19 = vld [vmem:[#allocation2 + $0x48] sm:$0xff] }
  0x18   :  { %495 = vmatprep.subr.bf16.mxu0 %v581_v0  ;;  %v656_v17 = vld [vmem:[#allocation2 + $0x18] sm:$0xff]  ;;  %v663_v20 = vld [vmem:[#allocation2 + $0x50] sm:$0xff]  ;;  %v666_v22 = vld [vmem:[#allocation2 + $0x20] sm:$0xff]  ;;  %v74_v23 = vadd.f32 %v661_v19, %v659_v18  ;;  %v502_v28 = vpack.c.bf16 %v125_v16, %v124_v15 }
  0x19   :  { %v62_v21 = vadd.f32 %v61_v13, %v646_v12  ;;  %v126_v24 = vld [vmem:[%s835_s1 + $0x40] sm:$0xff]  ;;  %v673_v25 = vld [vmem:[#allocation2 + $0x58] sm:$0xff]  ;;  %v678_v29 = vld [vmem:[#allocation2 + $0x28] sm:$0xff] }
  0x1a   :  { %v675_v26 = vld [vmem:[#allocation2 + $0x80] sm:$0xff]  ;;  %v680_v30 = vld [vmem:[#allocation2 + $0x88] sm:$0xff]  ;;  %v682_v31 = vld [vmem:[#allocation2 + $0x90] sm:$0xff]  ;;  %v75_v32 = vadd.f32 %v74_v23, %v663_v20 }
  0x1b   :  { %497 = vmatpush3.bf16.msra.mxu0 %v496_v7  ;;  %v63_v27 = vadd.f32 %v62_v21, %v656_v17  ;;  %v127_v33 = vld [vmem:[%s835_s1 + $0x48] sm:$0xff]  ;;  %v689_v34 = vld [vmem:[#allocation2 + $0x30] sm:$0xff]  ;;  %v691_v35 = vld [vmem:[#allocation2 + $0x60] sm:$0xff]  ;;  %v87_v37 = vadd.f32 %v680_v30, %v675_v26 }
  0x1c   :  { %498 = vmatprep.subr.bf16.mxu0 %v581_v0  ;;  %v696_v38 = vld [vmem:[#allocation2 + $0x98] sm:$0xff]  ;;  %v698_v39 = vld [vmem:[#allocation2 + $0xc0] sm:$0xff]  ;;  %v700_v40 = vld [vmem:[#allocation2 + $0xc8] sm:$0xff]  ;;  %v76_v41 = vadd.f32 %v75_v32, %v673_v25  ;;  %v505_v49 = vpack.c.bf16 %v127_v33, %v126_v24 }
  0x1d   :  { %v64_v36 = vadd.f32 %v63_v27, %v666_v22  ;;  %v128_v42 = vld [vmem:[%s835_s1 + $0x50] sm:$0xff]  ;;  %v129_v43 = vld [vmem:[%s835_s1 + $0x58] sm:$0xff]  ;;  %v709_v44 = vld [vmem:[#allocation2 + $0x68] sm:$0xff]  ;;  %v88_v47 = vadd.f32 %v87_v37, %v682_v31  ;;  %v100_v48 = vadd.f32 %v700_v40, %v698_v39 }
  0x1e   :  { %v711_v45 = vld [vmem:[#allocation2 + $0xd0] sm:$0xff]  ;;  %v717_v50 = vld [vmem:[#allocation2 + $0x38] sm:$0xff]  ;;  %v719_v51 = vld [vmem:[#allocation2 + $0xa0] sm:$0xff]  ;;  %v77_v53 = vadd.f32 %v76_v41, %v691_v35  ;;  %v508_v5 = vpack.c.bf16 %v129_v43, %v128_v42 }
  0x1f   :  { %500 = vmatpush3.bf16.msra.mxu0 %v499_v14  ;;  %v65_v46 = vadd.f32 %v64_v36, %v678_v29  ;;  %v721_v52 = vld [vmem:[#allocation2 + $0xd8] sm:$0xff]  ;;  %v725_v54 = vld [vmem:[#allocation2 + $0x70] sm:$0xff]  ;;  %v89_v56 = vadd.f32 %v88_v47, %v696_v38  ;;  %v101_v57 = vadd.f32 %v100_v48, %v711_v45  ;;  %v216_v58 = vld [vmem:[%s836_s2] sm:$0xff] }
  0x20   :  { %501 = vmatprep.subr.bf16.mxu0 %v581_v0  ;;  %v217_v59 = vld [vmem:[%s836_s2 + $0x8] sm:$0xff]  ;;  %v738_v61 = vld [vmem:[#allocation2 + $0xe0] sm:$0xff]  ;;  %v78_v62 = vadd.f32 %v77_v53, %v709_v44  ;;  %v741_v1 = vld [vmem:[#allocation2 + $0x78] sm:$0xff] }
  0x21   :  { %v66_v55 = vadd.f32 %v65_v46, %v689_v34  ;;  %v736_v60 = vld [vmem:[#allocation2 + $0xa8] sm:$0xff]  ;;  %v517_v63 = vpack.c.bf16 %v217_v59, %v216_v58  ;;  %v90_v3 = vadd.f32 %v89_v56, %v719_v51  ;;  %v102_v4 = vadd.f32 %v101_v57, %v721_v52  ;;  %v746_v6 = vld [vmem:[#allocation2 + $0xb0] sm:$0xff]  ;;  %v130_v9 = vld [vmem:[%s835_s1 + $0x60] sm:$0xff] }
  0x22   :  { %v748_v7 = vld [vmem:[#allocation2 + $0xe8] sm:$0xff]  ;;  %v79_v8 = vadd.f32 %v78_v62, %v725_v54  ;;  %v761_v21 = vld [vmem:[#allocation2 + $0xb8] sm:$0xff]  ;;  %v763_v23 = vld [vmem:[#allocation2 + $0xf0] sm:$0xff] }
  0x23   :  { %503 = vmatpush3.bf16.msra.mxu0 %v502_v28  ;;  %v67_v2 = vadd.f32 %v66_v55, %v717_v50  ;;  %518 = vmatpush3.bf16.msra.mxu1 %v517_v63  ;;  %v131_v13 = vld [vmem:[%s835_s1 + $0x68] sm:$0xff]  ;;  %v91_v15 = vadd.f32 %v90_v3, %v736_v60  ;;  %v103_v16 = vadd.f32 %v102_v4, %v738_v61  ;;  %v768_v36 = vld [vmem:[#allocation2 + $0xf8] sm:$0xff]  ;;  %v132_v41 = vld [vmem:[%s835_s1 + $0x70] sm:$0xff] }
  0x24   :  { %504 = vmatprep.subr.bf16.mxu0 %v581_v0  ;;  %519 = vmatprep.subr.bf16.mxu1 %v581_v0  ;;  %v80_v24 = vadd.f32 %v79_v8, %v741_v1  ;;  %v511_v33 = vpack.c.bf16 %v131_v13, %v130_v9  ;;  %v133_v42 = vld [vmem:[%s835_s1 + $0x78] sm:$0xff] }
  0x25   :  { %v68_v14 = vrot.slane %v67_v2, 4  ;;  %v92_v28 = vadd.f32 %v91_v15, %v746_v6  ;;  %v104_v32 = vadd.f32 %v103_v16, %v748_v7  ;;  %v514_v56 = vpack.c.bf16 %v133_v42, %v132_v41 }
  0x26   :  { %v81_v37 = vrot.slane %v80_v24, 4 }
  0x27   :  { %506 = vmatpush3.bf16.msra.mxu0 %v505_v49  ;;  %v69_v27 = vadd.f32 %v68_v14, %v67_v2  ;;  %v93_v46 = vadd.f32 %v92_v28, %v761_v21  ;;  %v105_v47 = vadd.f32 %v104_v32, %v763_v23 }
  0x28   :  { %507 = vmatprep.subr.bf16.mxu0 %v581_v0  ;;  %v82_v48 = vadd.f32 %v81_v37, %v80_v24 }
  0x29   :  { %v70_v43 = vrot.slane %v69_v27, 2  ;;  %v94_v53 = vrot.slane %v93_v46, 4  ;;  %v106_v55 = vadd.f32 %v105_v47, %v768_v36 }
  0x2a   :  { %v83_v57 = vrot.slane %v82_v48, 2 }
  0x2b   :  { %509 = vmatpush3.bf16.msra.mxu0 %v508_v5  ;;  %v71_v49 = vadd.f32 %v70_v43, %v69_v27  ;;  %v95_v59 = vadd.f32 %v94_v53, %v93_v46  ;;  %v107_v62 = vrot.slane %v106_v55, 4  ;;  %v218_v43 = vld [vmem:[%s836_s2 + $0x10] sm:$0xff]  ;;  %v219_v46 = vld [vmem:[%s836_s2 + $0x18] sm:$0xff]  ;;  %s585_s2 = smov [#allocation5]  }
  0x2c   :  { %510 = vmatprep.subr.bf16.mxu0 %v581_v0  ;;  %v84_v63 = vadd.f32 %v83_v57, %v82_v48  ;;  %v520_v47 = vpack.c.bf16 %v219_v46, %v218_v43  ;;  %v301_v57 = vlaneseq  ;;  %s411_s11 = sshll.u32 %s585_s2, 4  ;;  %s412_s11 = int_to_ptr.vmem [resolvable:$true] %s411_s11 }
  0x2d   :  { %v72_v58 = vrot.slane %v71_v49, 1  ;;  %v96_v3 = vrot.slane %v95_v59, 2  ;;  %v108_v4 = vadd.f32 %v107_v62, %v106_v55  ;;  %v584_v55 = vmov 1966171168   ;;  %s552_s12 = scalar_lea.vmem %s412_s11, 4096  ;;  %p557_p9 = scmp.lt.s32.totalorder %s412_s11, %s412_s11 }
  0x2e   :  { %v85_v5 = vrot.slane %v84_v63, 1  ;;  %521 = vmatpush3.bf16.msra.mxu1 %v520_v47  ;;  %p553_p8 = scmp.ne.s32.totalorder %s412_s11, %s552_s12  ;;  %p558_p10 = scmp.lt.s32.totalorder %s552_s12, %s552_s12 }
  0x2f   :  { %512 = vmatpush3.bf16.msra.mxu0 %v511_v33  ;;  %v73_v2 = vadd.f32 %v72_v58, %v71_v49  ;;  %v97_v8 = vadd.f32 %v96_v3, %v95_v59  ;;  %v109_v9 = vrot.slane %v108_v4, 2 }
  0x30   :  { %513 = vmatprep.subr.bf16.mxu0 %v581_v0  ;;  %v86_v13 = vadd.f32 %v85_v5, %v84_v63  ;;  %v302_v63 = vshrl.u32 %v301_v57, 7  ;;  %p559_p11 = por %p558_p10, %p557_p9 }
  0x31   :  { %v114_v14 = vmul.f32 0.015625, %v73_v2  ;;  %v98_v15 = vrot.slane %v97_v8, 1  ;;  %v110_v16 = vadd.f32 %v109_v9, %v108_v4 }
  0x32   :  { %v115_v24 = vmul.f32 0.015625, %v86_v13  ;;  %v324_v13 = vsub.s32 0, %v302_v63  ;;  %p560_p12 = pnand %p559_p11, %p553_p8 }
  0x33   :  { %515 = vmatpush3.bf16.msra.mxu0 %v514_v56  ;;  %v99_v27 = vadd.f32 %v98_v15, %v97_v8  ;;  %v111_v28 = vrot.slane %v110_v16, 1  ;;  %v299_v56 = vunpack.c.l.s4 %v584_v55 }
  0x34   :  { %v139_v0 = vsel %vm138_vm1, %v115_v24, %v114_v14 }
  0x35   :  { %v112_v32 = vadd.f32 %v111_v28, %v110_v16  ;;  %v116_v33 = vmul.f32 0.015625, %v99_v27  ;;  %v300_v62 = vunpack.c.0.s8 %v299_v56 }
  0x37   :  { %v117_v37 = vmul.f32 0.015625, %v112_v32  ;;  %v141_v41 = vsel %vm140_vm2, %v116_v33, %v139_v0  ;;  %v303_v5 = vsub.s32 %v300_v62, %v302_v63 }
  0x39   :  { %v143_v42 = vsel %vm142_vm3, %v117_v37, %v141_v41 }
  0x3a   :  { %479 = vmatmul.mubr.f32.vlgmr.msra.gmra.mrb[0].mxu0 %v143_v42 }
 0x10d   :  { %v211_v48 = vpop.f32.mrb[0].mxu0 }
 0x10e   :  { %v215_v49 = vmax.f32 %v211_v48, 0.0  ;;  %v480_v53 = vpop.f32.mrb[1].mxu0 }
 0x110   :  { %490 = vmatmul.mubr.msk.f32.vlgmr.msra.gmra.mrb[0].mxu1 %vm220_vm4, %v215_v49 }
 0x1e3   :  { %v290_v58 = vpop.f32.mrb[0].mxu1 }
 0x1e4   :  { %v291_v59 = vadd.f32 3.0, %v290_v58  ;;  %v491_v2 = vpop.f32.mrb[1].mxu1 }
 0x1e6   :  { %v294_v3 = vmax.f32 %v291_v59, 0.0 }
 0x1e8   :  { %v295_v4 = vmin.f32 %v294_v3, 6.0 }
 0x1ea   :  { %v296_v8 = vmul.f32 0.16666667, %v295_v4 }
 0x1ec   :  { %v304_v9 = vrot.slane %v296_v8, %v303_v5 }
 0x1ee   :  { %v305_v14 = vcombine.high %v304_v9, %v304_v9  ;;  %v312_v15 = vrot.slane %v304_v9, %v303_v5 }
 0x1f0   :  { %v319_v16 = vrot.slane %v305_v14, %v303_v5  ;;  %v320_v24 = vcombine.high %v312_v15, %v312_v15  ;;  %v325_v27 = vrot.slane %v312_v15, %v324_v13 }
 0x1f2   :  { %v321_v28 = vcombine.high %v319_v16, %v319_v16  ;;  %v329_v0 = vrot.slane %v319_v16, %v324_v13  ;;  %v333_v32 = vrot.slane %v320_v24, %v324_v13  ;;  %v342_v33 = vmul.f32 %v325_v27, %v642_v10 }
 0x1f3   :  { %v343_v37 = vmul.f32 %v325_v27, %v644_v11  ;;  %v344_v41 = vmul.f32 %v325_v27, %v646_v12  ;;  %v345_v42 = vmul.f32 %v325_v27, %v656_v17  ;;  %v346_v43 = vmul.f32 %v325_v27, %v666_v22 }
 0x1f4   :  { %v337_v46 = vrot.slane %v321_v28, %v324_v13  ;;  %v347_v47 = vmul.f32 %v325_v27, %v678_v29  ;;  %v348_v48 = vmul.f32 %v325_v27, %v689_v34  ;;  %v349_v49 = vmul.f32 %v325_v27, %v717_v50  ;;  %374 = vst [vmem:[#allocation5] sm:$0xff] %v342_v33 }
 0x1f5   :  { %v350_v53 = vmul.f32 %v329_v0, %v659_v18  ;;  %v351_v10 = vmul.f32 %v329_v0, %v661_v19  ;;  %v352_v11 = vmul.f32 %v329_v0, %v663_v20  ;;  %v353_v12 = vmul.f32 %v329_v0, %v673_v25  ;;  %375 = vst [vmem:[#allocation5 + $0x8] sm:$0xff] %v343_v37 }
 0x1f6   :  { %376 = vst [vmem:[#allocation5 + $0x10] sm:$0xff] %v344_v41  ;;  %377 = vst [vmem:[#allocation5 + $0x18] sm:$0xff] %v345_v42  ;;  %v354_v17 = vmul.f32 %v329_v0, %v691_v35  ;;  %v355_v22 = vmul.f32 %v329_v0, %v709_v44  ;;  %v356_v29 = vmul.f32 %v329_v0, %v725_v54 }
 0x1f7   :  { %378 = vst [vmem:[#allocation5 + $0x20] sm:$0xff] %v346_v43  ;;  %v357_v34 = vmul.f32 %v329_v0, %v741_v1  ;;  %379 = vst [vmem:[#allocation5 + $0x28] sm:$0xff] %v347_v47  ;;  %v358_v18 = vmul.f32 %v333_v32, %v675_v26  ;;  %v359_v19 = vmul.f32 %v333_v32, %v680_v30 }
 0x1f8   :  { %380 = vst [vmem:[#allocation5 + $0x30] sm:$0xff] %v348_v48  ;;  %381 = vst [vmem:[#allocation5 + $0x38] sm:$0xff] %v349_v49  ;;  %v360_v20 = vmul.f32 %v333_v32, %v682_v31  ;;  %v361_v25 = vmul.f32 %v333_v32, %v696_v38  ;;  %v362_v35 = vmul.f32 %v333_v32, %v719_v51 }
 0x1f9   :  { %382 = vst [vmem:[#allocation5 + $0x40] sm:$0xff] %v350_v53  ;;  %383 = vst [vmem:[#allocation5 + $0x48] sm:$0xff] %v351_v10  ;;  %v363_v44 = vmul.f32 %v333_v32, %v736_v60  ;;  %v364_v50 = vmul.f32 %v333_v32, %v746_v6  ;;  %v365_v26 = vmul.f32 %v333_v32, %v761_v21 }
 0x1fa   :  { %384 = vst [vmem:[#allocation5 + $0x50] sm:$0xff] %v352_v11  ;;  %385 = vst [vmem:[#allocation5 + $0x58] sm:$0xff] %v353_v12  ;;  %v366_v30 = vmul.f32 %v337_v46, %v698_v39  ;;  %v367_v31 = vmul.f32 %v337_v46, %v700_v40  ;;  %v368_v38 = vmul.f32 %v337_v46, %v711_v45 }
 0x1fb   :  { %386 = vst [vmem:[#allocation5 + $0x60] sm:$0xff] %v354_v17  ;;  %387 = vst [vmem:[#allocation5 + $0x68] sm:$0xff] %v355_v22  ;;  %v369_v54 = vmul.f32 %v337_v46, %v721_v52  ;;  %v370_v51 = vmul.f32 %v337_v46, %v738_v61  ;;  %v371_v60 = vmul.f32 %v337_v46, %v748_v7 }
 0x1fc   :  { %388 = vst [vmem:[#allocation5 + $0x70] sm:$0xff] %v356_v29  ;;  %389 = vst [vmem:[#allocation5 + $0x78] sm:$0xff] %v357_v34  ;;  %v372_v1 = vmul.f32 %v337_v46, %v763_v23  ;;  %v373_v6 = vmul.f32 %v337_v46, %v768_v36 }
 0x1fd   :  { %390 = vst [vmem:[#allocation5 + $0x80] sm:$0xff] %v358_v18  ;;  %391 = vst [vmem:[#allocation5 + $0x88] sm:$0xff] %v359_v19 }
 0x1fe   :  { %392 = vst [vmem:[#allocation5 + $0x90] sm:$0xff] %v360_v20  ;;  %393 = vst [vmem:[#allocation5 + $0x98] sm:$0xff] %v361_v25 }
 0x1ff   :  { %394 = vst [vmem:[#allocation5 + $0xa0] sm:$0xff] %v362_v35  ;;  %395 = vst [vmem:[#allocation5 + $0xa8] sm:$0xff] %v363_v44 }
 0x200   :  { %396 = vst [vmem:[#allocation5 + $0xb0] sm:$0xff] %v364_v50  ;;  %397 = vst [vmem:[#allocation5 + $0xb8] sm:$0xff] %v365_v26 }
 0x201   :  { %398 = vst [vmem:[#allocation5 + $0xc0] sm:$0xff] %v366_v30  ;;  %399 = vst [vmem:[#allocation5 + $0xc8] sm:$0xff] %v367_v31 }
 0x202   :  { %400 = vst [vmem:[#allocation5 + $0xd0] sm:$0xff] %v368_v38  ;;  %401 = vst [vmem:[#allocation5 + $0xd8] sm:$0xff] %v369_v54 }
 0x203   :  { %402 = vst [vmem:[#allocation5 + $0xe0] sm:$0xff] %v370_v51  ;;  %403 = vst [vmem:[#allocation5 + $0xe8] sm:$0xff] %v371_v60 }
 0x204   :  { %404 = vst [vmem:[#allocation5 + $0xf0] sm:$0xff] %v372_v1  ;;  %405 = vst [vmem:[#allocation5 + $0xf8] sm:$0xff] %v373_v6 }
 0x205   :  { %563 = shalt.err (!%p560_p12)
}
 0x206   :  { %s564_s15 = scalar_lea.hbm %s837_s3, 4096 }
 0x207   :  { %p565_p13 = scmp.ne.s32.totalorder %s837_s3, %s564_s15  ;;  %p568_p0 = scmp.lt.u32.totalorder %s564_s15, %s837_s3 }
 0x209   :  { %p570_p1 = pnand %p568_p0, %p565_p13 }
 0x20b   :  { %573 = shalt.err (!%p570_p1)
}
 0x20c   :  { %417 = dma.vmem_to_hbm [thread:$0]  %s412_s11, 4096, %s837_s3, [#allocation4], %s579_s22, %s579_s22, %s580_s23  }
 0x20d   :  { %576 = dma.done.wait [#allocation4], 4096  }
 0x20e   :  { %577 = vsyncadd [#allocation4], 4294963200 }
 0x20f   :  { %421 = vsyncpa [#allocation3], 1 }
 0x210   :  { %422 = vsyncpa [#allocation4], 1 }

</bundles_post_ra>
